<compile_context>
chip_gen: v6e
topology: v6e:2x2x1
jax: 0.10.0
libtpu: 0.0.40
codegen_flags: <defaults>
</compile_context>

<pallas_src>
import functools
import math

import jax
import jax.numpy as jnp
from jax import lax
from jax.experimental import pallas as pl
from jax.experimental.pallas import tpu as pltpu


def _round_up(v, m):
    return ((v + m - 1) // m) * m


# =============================================================================
# Kernel 1: fused fc0+ReLU + full GCNII conv stack (grid over layers)
# =============================================================================
def _gcn_stack_kernel(omt_ref, nvalid_ref,                     # SMEM scalar prefetch
                      x_ref, adj_hbm, w0_ref, b0_ref, w_ref,   # inputs
                      h_out_ref,                               # output (last layer)
                      adj_scr, h0_scr, h_scr,                  # VMEM scratch
                      *, alpha):
    l = pl.program_id(0)

    @pl.when(l == 0)
    def _():
        # adj: HBM -> VMEM exactly once (layer-invariant, single-buffered).
        pltpu.sync_copy(adj_hbm, adj_scr)
        # h0 = relu(x @ W0 + b0); mask padding rows (bias leaks into them).
        h0 = jnp.dot(x_ref[...], w0_ref[...], preferred_element_type=jnp.float32)
        h0 = jnp.maximum(h0 + b0_ref[...], 0.0)
        row = lax.broadcasted_iota(jnp.int32, h0.shape, 0)
        h0 = jnp.where(row < nvalid_ref[0], h0, 0.0)
        h0_scr[...] = h0.astype(jnp.bfloat16)

    # Layer 0 consumes h0 directly; later layers read the running activation.
    h = lax.cond(l == 0, lambda: h0_scr[...], lambda: h_scr[...])

    one_minus_theta = omt_ref[l]                       # per-layer scalar from SMEM
    hi = jnp.dot(adj_scr[...], h, preferred_element_type=jnp.float32)
    support = (1.0 - alpha) * hi + alpha * h0_scr[...].astype(jnp.float32)
    # theta pre-baked into the weight: out = support @ (theta*W) + (1-theta)*support
    out = jnp.dot(support.astype(jnp.bfloat16), w_ref[...],
                  preferred_element_type=jnp.float32)
    out = out + one_minus_theta * support
    h_new = jnp.maximum(out, 0.0)                      # act_fn after each conv
    h_scr[...] = h_new.astype(jnp.bfloat16)

    @pl.when(l == pl.num_programs(0) - 1)
    def _():
        h_out_ref[...] = h_new.astype(h_out_ref.dtype)


def gcn_stack(x_pad, adj_pad, w0, b0, w_scaled, one_minus_theta, n_valid, alpha):
    n_pad, f_pad = x_pad.shape
    h_dim = w0.shape[1]
    nlayers = w_scaled.shape[0]
    assert nlayers >= 1

    # Explicit VMEM budget: adj scratch (1x) + h0/h scratch + double-buffered
    # small inputs + output, with headroom; 16 MiB floor.
    est = (n_pad * n_pad * 2                       # adj scratch (bf16, single buffer)
           + 2 * n_pad * h_dim * 2                 # h0 + h scratch (bf16)
           + 2 * n_pad * f_pad * 2                 # x (double-buffered)
           + 2 * f_pad * h_dim * 2                 # W0
           + 2 * h_dim * h_dim * 2                 # W_l
           + 2 * n_pad * h_dim * 2                 # output
           + 2 * 8 * h_dim * 4)                    # b0 (sublane-padded)
    vmem_limit = int(max(2 * est + (4 << 20), 16 << 20))

    kernel = functools.partial(_gcn_stack_kernel, alpha=float(alpha))
    return pl.pallas_call(
        kernel,
        out_shape=jax.ShapeDtypeStruct((n_pad, h_dim), jnp.bfloat16),
        grid_spec=pltpu.PrefetchScalarGridSpec(
            num_scalar_prefetch=2,
            grid=(nlayers,),
            in_specs=[
                pl.BlockSpec((n_pad, f_pad), lambda l, omt, nv: (0, 0)),   # x (resident)
                pl.BlockSpec(memory_space=pl.ANY),                         # adj (manual copy)
                pl.BlockSpec((f_pad, h_dim), lambda l, omt, nv: (0, 0)),   # W0 (resident)
                pl.BlockSpec((1, h_dim), lambda l, omt, nv: (0, 0)),       # b0 (resident)
                pl.BlockSpec((pl.Squeezed(), h_dim, h_dim),
                             lambda l, omt, nv: (l, 0, 0)),                # theta*W_l
            ],
            out_specs=pl.BlockSpec((n_pad, h_dim), lambda l, omt, nv: (0, 0)),
            scratch_shapes=[
                pltpu.VMEM((n_pad, n_pad), jnp.bfloat16),   # adj (single buffer)
                pltpu.VMEM((n_pad, h_dim), jnp.bfloat16),   # h0
                pltpu.VMEM((n_pad, h_dim), jnp.bfloat16),   # running h
            ],
        ),
        compiler_params=pltpu.CompilerParams(
            dimension_semantics=("arbitrary",),             # layers are sequential
            vmem_limit_bytes=vmem_limit),
    )(one_minus_theta, jnp.asarray([n_valid], jnp.int32),
      x_pad, adj_pad, w0, b0, w_scaled)


# =============================================================================
# Kernel 2: fused residue-concat + output Linear + log_softmax, row-tiled grid.
#   logits = x @ Wx + h @ Wh + b  (== concat([x, h]) @ W + b, never built in HBM)
# =============================================================================
def _head_kernel(x_ref, h_ref, wx_ref, wh_ref, b_ref, o_ref, *, nclass):
    logits = jnp.dot(x_ref[...], wx_ref[...], preferred_element_type=jnp.float32)
    logits = logits + jnp.dot(h_ref[...], wh_ref[...],
                              preferred_element_type=jnp.float32)
    logits = logits + b_ref[...]
    # mask padded class columns (finite value: no inf-inf NaN risk)
    col = lax.broadcasted_iota(jnp.int32, logits.shape, 1)
    logits = jnp.where(col < nclass, logits, -1e30)
    m = jnp.max(logits, axis=1, keepdims=True)
    z = logits - m
    lse = jnp.log(jnp.sum(jnp.exp(z), axis=1, keepdims=True))
    o_ref[...] = z - lse


def head_logsoftmax(x_pad, h_pad, wx, wh, b, nclass, *, row_tile=128):
    n_pad, f_pad = x_pad.shape
    h_dim = h_pad.shape[1]
    c_pad = wx.shape[1]
    tn = min(row_tile, n_pad)
    est = 2 * (tn * f_pad * 2 + tn * h_dim * 2 + f_pad * c_pad * 2
               + h_dim * c_pad * 2 + 8 * c_pad * 4 + tn * c_pad * 4)
    vmem_limit = int(max(2 * est + (4 << 20), 16 << 20))

    kernel = functools.partial(_head_kernel, nclass=int(nclass))
    return pl.pallas_call(
        kernel,
        out_shape=jax.ShapeDtypeStruct((n_pad, c_pad), jnp.float32),
        grid=(n_pad // tn,),
        in_specs=[
            pl.BlockSpec((tn, f_pad), lambda i: (i, 0)),     # x row tile
            pl.BlockSpec((tn, h_dim), lambda i: (i, 0)),     # h row tile
            pl.BlockSpec((f_pad, c_pad), lambda i: (0, 0)),  # Wx (resident)
            pl.BlockSpec((h_dim, c_pad), lambda i: (0, 0)),  # Wh (resident)
            pl.BlockSpec((1, c_pad), lambda i: (0, 0)),      # b (resident)
        ],
        out_specs=pl.BlockSpec((tn, c_pad), lambda i: (i, 0)),
        compiler_params=pltpu.CompilerParams(
            dimension_semantics=("parallel",),
            vmem_limit_bytes=vmem_limit),
    )(x_pad, h_pad, wx, wh, b)


# =============================================================================
# Glue: adjacency construction (message_passing_wo_speaker), plain JAX
# =============================================================================
def message_passing_wo_speaker(x, dia_len):
    n = x.shape[0]
    adj = jnp.zeros((n, n), jnp.float32)
    start = 0
    for length in dia_len:
        temp = x[start:start + length]                                # (L, D)
        vec_length = jnp.sqrt(jnp.sum(temp * temp, axis=1))           # (L,)
        vec_length = jnp.maximum(vec_length, 1e-8)                    # zero-row guard
        norm_temp = temp / vec_length[:, None]
        cos_sim = jnp.clip(norm_temp @ norm_temp.T, -1.0, 1.0) * 0.99999
        sim = jnp.arccos(cos_sim)
        d = jnp.maximum(sim.sum(axis=1), 1e-8)                        # d==0 guard
        dinv = d ** -0.5
        sub = sim * dinv[:, None] * dinv[None, :]                     # D @ sim @ D
        adj = adj.at[start:start + length, start:start + length].set(sub)
        start += length
    return adj


# =============================================================================
# Parameters (kernel copies stored pre-padded, bf16; raw f32 kept for reference)
# =============================================================================
class GCNIIParams:
    def __init__(self, key, nfeat, nlayers, nhidden, nclass, lamda, alpha,
                 return_feature, use_residue):
        self.nlayers = nlayers
        self.return_feature = return_feature
        self.use_residue = use_residue
        self.lamda = float(lamda)
        self.alpha = float(alpha)
        self.nfeat, self.nhidden, self.nclass = nfeat, nhidden, nclass
        self.F_pad = _round_up(nfeat, 128)
        self.H_pad = _round_up(nhidden, 128)
        self.C_pad = _round_up(nclass, 128)

        keys = jax.random.split(key, nlayers + 4)
        ki = iter(keys)

        thetas = [math.log(lamda / (i + 1) + 1.0) for i in range(nlayers)]
        self.one_minus_theta = jnp.asarray([1.0 - t for t in thetas], jnp.float32)

        # GraphConvolution weights: uniform(-1/sqrt(out), 1/sqrt(out)), stacked.
        stdv = 1.0 / math.sqrt(nhidden)
        conv = jnp.stack([
            jax.random.uniform(next(ki), (nhidden, nhidden), jnp.float32, -stdv, stdv)
            for _ in range(nlayers)])
        self.conv_w_raw = conv                                  # f32, for reference
        conv_pad = jnp.pad(conv, ((0, 0),
                                  (0, self.H_pad - nhidden),
                                  (0, self.H_pad - nhidden)))
        theta_arr = jnp.asarray(thetas, jnp.float32)[:, None, None]
        self.conv_w_scaled = (theta_arr * conv_pad).astype(jnp.bfloat16)  # theta baked in

        # fcs[0]: Linear(nfeat, nhidden), stored (in, out): y = x @ W + b
        k0 = 1.0 / math.sqrt(nfeat)
        fc0_w = jax.random.uniform(next(ki), (nfeat, nhidden), jnp.float32, -k0, k0)
        fc0_b = jax.random.uniform(next(ki), (1, nhidden), jnp.float32, -k0, k0)
        self.fc0_w_raw, self.fc0_b_raw = fc0_w, fc0_b
        self.fc0_w = jnp.pad(fc0_w, ((0, self.F_pad - nfeat),
                                     (0, self.H_pad - nhidden))).astype(jnp.bfloat16)
        self.fc0_b = jnp.pad(fc0_b, ((0, 0), (0, self.H_pad - nhidden)))   # f32

        if not return_feature:
            fin = nfeat + nhidden
            k1 = 1.0 / math.sqrt(fin)
            fc1_w = jax.random.uniform(next(ki), (fin, nclass), jnp.float32, -k1, k1)
            fc1_b = jax.random.uniform(next(ki), (1, nclass), jnp.float32, -k1, k1)
            self.fc1_w_raw, self.fc1_b_raw = fc1_w, fc1_b
            # split so concat([x, h]) @ W == x @ Wx + h @ Wh (fused in-kernel)
            wx, wh = fc1_w[:nfeat], fc1_w[nfeat:]
            self.fc1_wx = jnp.pad(wx, ((0, self.F_pad - nfeat),
                                       (0, self.C_pad - nclass))).astype(jnp.bfloat16)
            self.fc1_wh = jnp.pad(wh, ((0, self.H_pad - nhidden),
                                       (0, self.C_pad - nclass))).astype(jnp.bfloat16)
            self.fc1_b = jnp.pad(fc1_b, ((0, 0), (0, self.C_pad - nclass)))  # f32


# =============================================================================
# Forward
# =============================================================================
def gcnii_forward(params, x, dia_len, adj=None):
    # training=False -> every F.dropout is identity
    n, nfeat = x.shape
    if adj is None:
        adj = message_passing_wo_speaker(x, dia_len)

    n_pad = _round_up(n, 128)     # lane-dense adj tiles / full MXU contraction
    x_pad = jnp.pad(x, ((0, n_pad - n),
                        (0, params.F_pad - nfeat))).astype(jnp.bfloat16)
    adj_pad = jnp.pad(adj, ((0, n_pad - n), (0, n_pad - n))).astype(jnp.bfloat16)

    # Fused fc0+ReLU + full GCNII conv stack (single pallas_call)
    h_pad = gcn_stack(x_pad, adj_pad, params.fc0_w, params.fc0_b,
                      params.conv_w_scaled, params.one_minus_theta, n, params.alpha)

    if params.return_feature:
        h = h_pad[:n, :params.nhidden].astype(jnp.float32)
        if params.use_residue:
            return jnp.concatenate([x, h], axis=-1)
        return h

    # not return_feature: the reference module's fcs[-1] expects nfeat+nhidden,
    # i.e. it is only shape-consistent with use_residue=True.
    out_pad = head_logsoftmax(x_pad, h_pad, params.fc1_wx, params.fc1_wh,
                              params.fc1_b, params.nclass)
    return out_pad[:n, :params.nclass]


# =============================================================================
# Pure-JAX reference (same bf16-input / f32-accumulate matmul convention)
# =============================================================================
def _bf16_dot(a, b):
    return jnp.dot(a.astype(jnp.bfloat16), b.astype(jnp.bfloat16),
                   preferred_element_type=jnp.float32)


def _reference_forward(params, x, dia_len):
    adj = message_passing_wo_speaker(x, dia_len)
    h = jax.nn.relu(_bf16_dot(x, params.fc0_w_raw) + params.fc0_b_raw)
    h0 = h
    for i in range(params.nlayers):
        theta = math.log(params.lamda / (i + 1) + 1.0)
        hi = _bf16_dot(adj, h)
        support = (1.0 - params.alpha) * hi + params.alpha * h0
        h = jax.nn.relu(theta * _bf16_dot(support, params.conv_w_raw[i])
                        + (1.0 - theta) * support)
    cat = jnp.concatenate([x, h], axis=-1) if params.use_residue else h
    if params.return_feature:
        return cat
    logits = _bf16_dot(cat, params.fc1_w_raw) + params.fc1_b_raw
    return jax.nn.log_softmax(logits, axis=1)


# =============================================================================
if __name__ == "__main__":
    nfeat, nlayers, nhidden, nclass = 32, 2, 32, 6
    lamda, alpha = 0.5, 0.1
    return_feature = False
    use_residue = True
    dia_len = [10, 6]             # two dialogues, 16 nodes total
    n_nodes = sum(dia_len)

    key = jax.random.PRNGKey(0)
    kx, kp = jax.random.split(key)
    x = jax.random.normal(kx, (n_nodes, nfeat), jnp.float32)
    # topicLabel is unused by the message_passing_wo_speaker math path

    params = GCNIIParams(kp, nfeat, nlayers, nhidden, nclass, lamda, alpha,
                         return_feature, use_residue)

    out = gcnii_forward(params, x, dia_len)
    out = jax.block_until_ready(out)

    assert out.shape == (n_nodes, nclass)
    assert bool(jnp.all(jnp.isfinite(out)))

    ref = _reference_forward(params, x, dia_len)
    assert bool(jnp.allclose(out, ref, atol=2e-2, rtol=2e-2)), "mismatch vs reference"

    print("KERNEL_OK")
</pallas_src>

<mosaic_0001>
module attributes {stable_mosaic.version = 11 : i64} {
  func.func @_gcn_stack_kernel(%arg0: i32, %arg1: memref<2xf32, #tpu.memory_space<smem>>, %arg2: memref<1xi32, #tpu.memory_space<smem>>, %arg3: memref<128x128xbf16, #tpu.memory_space<vmem>>, %arg4: memref<128x128xbf16, #tpu.memory_space<any>>, %arg5: memref<128x128xbf16, #tpu.memory_space<vmem>>, %arg6: memref<1x128xf32, #tpu.memory_space<vmem>>, %arg7: memref<1x128x128xbf16, #tpu.memory_space<vmem>>, %arg8: memref<128x128xbf16, #tpu.memory_space<vmem>>, %arg9: memref<128x128xbf16, #tpu.memory_space<vmem>>, %arg10: memref<128x128xbf16, #tpu.memory_space<vmem>>, %arg11: memref<128x128xbf16, #tpu.memory_space<vmem>>) attributes {dimension_semantics = [#tpu.dimension_semantics<arbitrary>], iteration_bounds = array<i64: 2>, scalar_prefetch = 2 : i64, scratch_operands = 3 : i64, tpu.core_type = #tpu.core_type<tc>, window_params = [{pipeline_mode = #tpu.pipeline_mode<synchronous>, transform_indices = @transform_0, window_bounds = array<i64: 128, 128>}, {}, {pipeline_mode = #tpu.pipeline_mode<synchronous>, transform_indices = @transform_2, window_bounds = array<i64: 128, 128>}, {pipeline_mode = #tpu.pipeline_mode<synchronous>, transform_indices = @transform_3, window_bounds = array<i64: 1, 128>}, {transform_indices = @transform_4, window_bounds = array<i64: 1, 128, 128>}, {pipeline_mode = #tpu.pipeline_mode<synchronous>, transform_indices = @transform_5, window_bounds = array<i64: 128, 128>}]} {
    %c0_i32 = arith.constant 0 : i32
    %0 = arith.cmpi eq, %arg0, %c0_i32 : i32
    %1 = arith.extui %0 : i1 to i32
    %c0_i32_0 = arith.constant 0 : i32
    %2 = arith.cmpi ne, %1, %c0_i32_0 : i32
    scf.if %2 {
      "tpu.region"() ({
        %48 = tpu.sem_alloc : memref<!tpu.dma_semaphore, #tpu.memory_space<semaphore_mem>>
        tpu.enqueue_dma source(%arg4 : memref<128x128xbf16, #tpu.memory_space<any>>) target(%arg9 : memref<128x128xbf16, #tpu.memory_space<vmem>>) target_semaphore(%48 : memref<!tpu.dma_semaphore, #tpu.memory_space<semaphore_mem>>)
        tpu.wait_dma2 semaphore(%48 : memref<!tpu.dma_semaphore, #tpu.memory_space<semaphore_mem>>) src(%arg4 : memref<128x128xbf16, #tpu.memory_space<any>>) dst(%arg9 : memref<128x128xbf16, #tpu.memory_space<vmem>>)
        tpu.yield
      }) : () -> ()
      %c0_16 = arith.constant 0 : index
      %c0_17 = arith.constant 0 : index
      %32 = vector.load %arg3[%c0_16, %c0_17] : memref<128x128xbf16, #tpu.memory_space<vmem>>, vector<128x128xbf16>
      %c0_18 = arith.constant 0 : index
      %c0_19 = arith.constant 0 : index
      %33 = vector.load %arg5[%c0_18, %c0_19] : memref<128x128xbf16, #tpu.memory_space<vmem>>, vector<128x128xbf16>
      %cst_20 = arith.constant dense<0.000000e+00> : vector<128x128xf32>
      %34 = tpu.matmul %32, %33, %cst_20 {dimension_numbers = #tpu.dot_dimension_numbers<[1], [0], [0], [1], [0, 0, 1, 1], [], []>} : vector<128x128xbf16>, vector<128x128xbf16>, vector<128x128xf32> -> vector<128x128xf32>
      %c0_21 = arith.constant 0 : index
      %c0_22 = arith.constant 0 : index
      %35 = vector.load %arg6[%c0_21, %c0_22] : memref<1x128xf32, #tpu.memory_space<vmem>>, vector<1x128xf32>
      %36 = vector.broadcast %35 : vector<1x128xf32> to vector<128x128xf32>
      %37 = arith.addf %34, %36 : vector<128x128xf32>
      %cst_23 = arith.constant 0.000000e+00 : f32
      %38 = vector.broadcast %cst_23 : f32 to vector<128x128xf32>
      %39 = arith.maximumf %37, %38 : vector<128x128xf32>
      %40 = tpu.iota {dimensions = array<i32: 0>} : vector<128x128xi32>
      %c0_24 = arith.constant 0 : index
      %41 = memref.load %arg2[%c0_24] : memref<1xi32, #tpu.memory_space<smem>>
      %42 = vector.broadcast %41 : i32 to vector<128x128xi32>
      %43 = arith.cmpi slt, %40, %42 : vector<128x128xi32>
      %cst_25 = arith.constant 0.000000e+00 : f32
      %44 = vector.broadcast %cst_25 : f32 to vector<128x128xf32>
      %45 = arith.select %43, %39, %44 : vector<128x128xi1>, vector<128x128xf32>
      %46 = arith.truncf %45 : vector<128x128xf32> to vector<128x128xbf16>
      %c0_26 = arith.constant 0 : index
      %c0_27 = arith.constant 0 : index
      %47 = vector.load %arg10[%c0_26, %c0_27] : memref<128x128xbf16, #tpu.memory_space<vmem>>, vector<128x128xbf16>
      tpu.vector_store %arg10[%c0_26, %c0_27], %46 {strides = array<i32>} : memref<128x128xbf16, #tpu.memory_space<vmem>>, vector<128x128xbf16>,
    } else {
    }
    %c0_i32_1 = arith.constant 0 : i32
    %3 = arith.cmpi eq, %arg0, %c0_i32_1 : i32
    %4 = arith.extui %3 : i1 to i32
    %c0_i32_2 = arith.constant 0 : i32
    %5 = arith.cmpi ne, %4, %c0_i32_2 : i32
    %6 = scf.if %5 -> (vector<128x128xbf16>) {
      %c0_16 = arith.constant 0 : index
      %c0_17 = arith.constant 0 : index
      %32 = vector.load %arg10[%c0_16, %c0_17] : memref<128x128xbf16, #tpu.memory_space<vmem>>, vector<128x128xbf16>
      scf.yield %32 : vector<128x128xbf16>
    } else {
      %c0_16 = arith.constant 0 : index
      %c0_17 = arith.constant 0 : index
      %32 = vector.load %arg11[%c0_16, %c0_17] : memref<128x128xbf16, #tpu.memory_space<vmem>>, vector<128x128xbf16>
      scf.yield %32 : vector<128x128xbf16>
    }
    %7 = arith.index_cast %arg0 : i32 to index
    %8 = memref.load %arg1[%7] : memref<2xf32, #tpu.memory_space<smem>>
    %c0 = arith.constant 0 : index
    %c0_3 = arith.constant 0 : index
    %9 = vector.load %arg9[%c0, %c0_3] : memref<128x128xbf16, #tpu.memory_space<vmem>>, vector<128x128xbf16>
    %cst = arith.constant dense<0.000000e+00> : vector<128x128xf32>
    %10 = tpu.matmul %9, %6, %cst {dimension_numbers = #tpu.dot_dimension_numbers<[1], [0], [0], [1], [0, 0, 1, 1], [], []>} : vector<128x128xbf16>, vector<128x128xbf16>, vector<128x128xf32> -> vector<128x128xf32>
    %cst_4 = arith.constant 0.899999976 : f32
    %11 = vector.broadcast %cst_4 : f32 to vector<128x128xf32>
    %12 = arith.mulf %11, %10 : vector<128x128xf32>
    %c0_5 = arith.constant 0 : index
    %c0_6 = arith.constant 0 : index
    %13 = vector.load %arg10[%c0_5, %c0_6] : memref<128x128xbf16, #tpu.memory_space<vmem>>, vector<128x128xbf16>
    %14 = arith.extf %13 : vector<128x128xbf16> to vector<128x128xf32>
    %cst_7 = arith.constant 1.000000e-01 : f32
    %15 = vector.broadcast %cst_7 : f32 to vector<128x128xf32>
    %16 = arith.mulf %15, %14 : vector<128x128xf32>
    %17 = arith.addf %12, %16 : vector<128x128xf32>
    %18 = arith.truncf %17 : vector<128x128xf32> to vector<128x128xbf16>
    %c0_8 = arith.constant 0 : index
    %c0_9 = arith.constant 0 : index
    %c0_10 = arith.constant 0 : index
    %19 = vector.load %arg7[%c0_8, %c0_9, %c0_10] : memref<1x128x128xbf16, #tpu.memory_space<vmem>>, vector<1x128x128xbf16>
    %20 = vector.shape_cast %19 : vector<1x128x128xbf16> to vector<128x128xbf16>
    %cst_11 = arith.constant dense<0.000000e+00> : vector<128x128xf32>
    %21 = tpu.matmul %18, %20, %cst_11 {dimension_numbers = #tpu.dot_dimension_numbers<[1], [0], [0], [1], [0, 0, 1, 1], [], []>} : vector<128x128xbf16>, vector<128x128xbf16>, vector<128x128xf32> -> vector<128x128xf32>
    %22 = vector.broadcast %8 : f32 to vector<128x128xf32>
    %23 = arith.mulf %22, %17 : vector<128x128xf32>
    %24 = arith.addf %21, %23 : vector<128x128xf32>
    %cst_12 = arith.constant 0.000000e+00 : f32
    %25 = vector.broadcast %cst_12 : f32 to vector<128x128xf32>
    %26 = arith.maximumf %24, %25 : vector<128x128xf32>
    %27 = arith.truncf %26 : vector<128x128xf32> to vector<128x128xbf16>
    %c0_13 = arith.constant 0 : index
    %c0_14 = arith.constant 0 : index
    %28 = vector.load %arg11[%c0_13, %c0_14] : memref<128x128xbf16, #tpu.memory_space<vmem>>, vector<128x128xbf16>
    tpu.vector_store %arg11[%c0_13, %c0_14], %27 {strides = array<i32>} : memref<128x128xbf16, #tpu.memory_space<vmem>>, vector<128x128xbf16>,
    %c1_i32 = arith.constant 1 : i32
    %29 = arith.cmpi eq, %arg0, %c1_i32 : i32
    %30 = arith.extui %29 : i1 to i32
    %c0_i32_15 = arith.constant 0 : i32
    %31 = arith.cmpi ne, %30, %c0_i32_15 : i32
    scf.if %31 {
      %32 = arith.truncf %26 : vector<128x128xf32> to vector<128x128xbf16>
      %c0_16 = arith.constant 0 : index
      %c0_17 = arith.constant 0 : index
      %33 = vector.load %arg8[%c0_16, %c0_17] : memref<128x128xbf16, #tpu.memory_space<vmem>>, vector<128x128xbf16>
      tpu.vector_store %arg8[%c0_16, %c0_17], %32 {strides = array<i32>} : memref<128x128xbf16, #tpu.memory_space<vmem>>, vector<128x128xbf16>,
    } else {
    }
    return
  }
  func.func @transform_0(%arg0: i32, %arg1: memref<2xf32, #tpu.memory_space<smem>>, %arg2: memref<1xi32, #tpu.memory_space<smem>>) -> (i32, i32) {
    %c0_i32 = arith.constant 0 : i32
    %c0_i32_0 = arith.constant 0 : i32
    %c0_i32_1 = arith.constant 0 : i32
    return %c0_i32, %c0_i32_0 : i32, i32
  }
  func.func @transform_2(%arg0: i32, %arg1: memref<2xf32, #tpu.memory_space<smem>>, %arg2: memref<1xi32, #tpu.memory_space<smem>>) -> (i32, i32) {
    %c0_i32 = arith.constant 0 : i32
    %c0_i32_0 = arith.constant 0 : i32
    %c0_i32_1 = arith.constant 0 : i32
    return %c0_i32, %c0_i32_0 : i32, i32
  }
  func.func @transform_3(%arg0: i32, %arg1: memref<2xf32, #tpu.memory_space<smem>>, %arg2: memref<1xi32, #tpu.memory_space<smem>>) -> (i32, i32) {
    %c0_i32 = arith.constant 0 : i32
    %c0_i32_0 = arith.constant 0 : i32
    %c0_i32_1 = arith.constant 0 : i32
    return %c0_i32, %c0_i32_0 : i32, i32
  }
  func.func @transform_4(%arg0: i32, %arg1: memref<2xf32, #tpu.memory_space<smem>>, %arg2: memref<1xi32, #tpu.memory_space<smem>>) -> (i32, i32, i32) {
    %c0_i32 = arith.constant 0 : i32
    %c0_i32_0 = arith.constant 0 : i32
    %c0_i32_1 = arith.constant 0 : i32
    return %arg0, %c0_i32, %c0_i32_0 : i32, i32, i32
  }
  func.func @transform_5(%arg0: i32, %arg1: memref<2xf32, #tpu.memory_space<smem>>, %arg2: memref<1xi32, #tpu.memory_space<smem>>) -> (i32, i32) {
    %c0_i32 = arith.constant 0 : i32
    %c0_i32_0 = arith.constant 0 : i32
    %c0_i32_1 = arith.constant 0 : i32
    return %c0_i32, %c0_i32_0 : i32, i32
  }
}

</mosaic_0001>

<bundles_post_ra>
// kernel: tpu_custom_call.1
= control target key start
LH: loop header
LB: loop body
LE: loop exit
PB: predicated region body
PF: predicated region fallthrough
CT: control target
= control target key end

     0   :  { %s3003_s0 = inlined_call_operand.vmem [shape: f32[2], index: 0, kind: input, shape index: {}]   ;;  %s3004_s1 = inlined_call_operand.<no memory space> [shape: s32[1], index: 1, kind: input, shape index: {}]   ;;  %s3005_s2 = inlined_call_operand.hbm [shape: bf16[128,128], index: 2, kind: input, shape index: {}]   ;;  %s3006_s3 = inlined_call_operand.hbm [shape: bf16[128,128], index: 3, kind: input, shape index: {}]   ;;  %s3007_s4 = inlined_call_operand.hbm [shape: bf16[128,128], index: 4, kind: input, shape index: {}]   ;;  %s3008_s5 = inlined_call_operand.vmem [shape: f32[1,128], index: 5, kind: input, shape index: {}]   ;;  %s3009_s6 = inlined_call_operand.hbm [shape: bf16[2,128,128], index: 6, kind: input, shape index: {}]   ;;  %s3010_s7 = inlined_call_operand.hbm [shape: bf16[128,128], index: 7, kind: output, shape index: {}]  }
   0x1   :  { %s12_s26 = sshll.u32 %s3003_s0, 4  ;;  %16 = sst [smem:[#allocation7]] %s3004_s1  ;;  %s13_s26 = int_to_ptr.vmem [resolvable:$true] %s12_s26 }
   0x2   :  { %s2140_s29 = scalar_lea.vmem %s13_s26, 16  ;;  %p2145_p1 = scmp.lt.s32.totalorder %s13_s26, %s13_s26 }
   0x3   :  { %p2141_p0 = scmp.ne.s32.totalorder %s13_s26, %s2140_s29  ;;  %p2146_p2 = scmp.lt.s32.totalorder %s2140_s29, %s2140_s29 }
   0x5   :  { %p2147_p3 = por %p2146_p2, %p2145_p1 }
   0x7   :  { %p2148_p4 = pnand %p2147_p3, %p2141_p0 }
   0x9   :  { %2151 = shalt.err (!%p2148_p4)  }
   0xa   :  { %s2456_s30 = smov [#allocation6]  }
   0xb   :  { %15 = dma.vmem_to_smem %s13_s26, 16, %s2456_s30, [#allocation5] }
   0xc   :  { %2356 = dma.done.wait [#allocation5], 16 }
   0xd   :  { %2357 = vsyncadd [#allocation5], 4294967280 }
   0xe   :  { %18 = sfence }
   0xf   :  { %19 = vsyncpa [#allocation9], 0 }
  0x10   :  { %20 = vsyncpa [#allocation12], 0 }
  0x11   :  { %21 = vsyncpa [#allocation10], 0  ;;  %s2512_s0 = smov 0   ;;  %s2514_s8 = smov 0  }
  0x12   :  { %s2516_s1 = smov 0   ;;  %s2518_s9 = smov 0  }
  0x13 LB: > { %s2531_s10 = sadd.s32 4294967295, %s2390_s9   ;;  %s2534_s11 = sadd.s32 1, %s2390_s9   ;;  %s2390_s9 = sphi %s2518_s9, %s3032_s9   ;;  %s2386_s1 = sphi %s2516_s1, %s3031_s1   ;;  %s2382_s8 = sphi %s2514_s8, %s3030_s8   ;;  %s2378_s0 = sphi %s2512_s0, %s3029_s0  }
  0x14   : > { %s94_s12 = ssub.s32 %s2390_s9, %s2534_s11  ;;  %s97_s13 = sadd.s32 1, %s2386_s1 }
  0x15   : > { %p95_p5 = scmp.eq.s32.totalorder %s94_s12, 0  ;;  %p104_p6 = scmp.ne.s32.totalorder %s2386_s1, %s2382_s8 }
  0x16   : > { %p105_p7 = scmp.eq.s32.totalorder %s2390_s9, 0  ;;  %p110_p8 = scmp.ne.s32.totalorder %s2382_s8, %s2378_s0 }
  0x17   : > { %s2544_s14 = scalar_select %p95_p5, %s2386_s1, %s97_s13  }
  0x18   : > { %p2546_p9 = por %p105_p7, %p104_p6  ;;  %p3011_p10 = scmp.eq.s32.totalorder %s2531_s10, 0 }
  0x19   : > { %p1378_p11 = scmp.ge.s32.totalorder %s2390_s9, 1  ;;  %p142_p12 = scmp.lt.s32.totalorder %s2390_s9, 3 }
  0x1a   : > { %p2555_p13 = por %p3011_p10, %p110_p8  ;;  %s2457_s18 = smov [#allocation8]  }
  0x1b   : > { %p2560_p1 = pnand %p1378_p11, %p142_p12  ;;  %s154_s19 = sshll.u32 %s2457_s18, 4  ;;  %s155_s19 = int_to_ptr.vmem [resolvable:$true] %s154_s19 }
  0x1c   : > { %s3015_s16 = scalar_select %p2555_p13, 1, 0 }
  0x1d   : > { %s3016_s17 = scalar_select %p2560_p1, 1, 0 }
  0x1e   : > { %p1920_p2 = pneg %p2560_p1  ;;  %p1933_p4 = scmp.lt.s32.totalorder %s2390_s9, 2 }
  0x1f   : > { %s2163_s22 = scalar_lea.vmem %s155_s19, 1024  ;;  %p2171_p12 = scmp.lt.s32.totalorder %s155_s19, %s155_s19 }
  0x20   : > { %p2568_p3 = pnand %p1920_p2, %p3011_p10  ;;  %p2575_p5 = pnand %p1933_p4, %p2546_p9 }
  0x21   : > { %p2164_p7 = scmp.ne.s32.totalorder %s155_s19, %s2163_s22  ;;  %p2172_p2 = scmp.lt.s32.totalorder %s2163_s22, %s2163_s22 }
  0x22   : > { %p2154_p6 = pneg %p2568_p3 }
  0x23   : > { %p2173_p0 = por %p2172_p2, %p2171_p12 }
  0x24   : > { %p2166_p8 = pnand %p2164_p7, %p2154_p6 }
  0x26   : > { %p2167_p11 = pneg %p2166_p8 }
  0x28   : > { %p2174_p10 = pnand %p2173_p0, %p2167_p11 }
  0x2a   : > { %2177 = shalt.err (!%p2174_p10)
}
  0x2b   : > { %s2458_s23 = smov 64   ;;  %s2459_s24 = smov 4  }
  0x2c   : > { %1923 = dma.hbm_to_vmem [thread:$0]  (!%p2568_p3), %s3005_s2, 1024, %s155_s19, [#allocation9], %s2458_s23, %s2458_s23, %s2459_s24  }
  0x2d   : > { %s2460_s27 = smov [#allocation11]   ;;  %s184_s29 = sand.u32 1, %s2390_s9  }
  0x2e   : > { %s167_s28 = sshll.u32 %s2460_s27, 4  ;;  %s168_s28 = int_to_ptr.vmem [resolvable:$true] %s167_s28 }
  0x2f   : > { %s2189_s30 = scalar_lea.vmem %s168_s28, 1024  ;;  %p2197_p4 = scmp.lt.s32.totalorder %s168_s28, %s168_s28 }
  0x30   : > { %p2190_p9 = scmp.ne.s32.totalorder %s168_s28, %s2189_s30  ;;  %p2198_p7 = scmp.lt.s32.totalorder %s2189_s30, %s2189_s30 }
  0x32   : > { %p2192_p10 = pnand %p2190_p9, %p2154_p6  ;;  %p2199_p8 = por %p2198_p7, %p2197_p4 }
  0x34   : > { %p2193_p0 = pneg %p2192_p10 }
  0x36   : > { %p2200_p11 = pnand %p2199_p8, %p2193_p0 }
  0x38   : > { %2203 = shalt.err (!%p2200_p11)
}
  0x39   : > { %1926 = dma.hbm_to_vmem [thread:$0]  (!%p2568_p3), %s3007_s4, 1024, %s168_s28, [#allocation12], %s2458_s23, %s2458_s23, %s2459_s24  }
  0x3a   : > { %s186_s13 = sand.u32 1, %s2386_s1   ;;  %s1468_s15 = sshll.u32 %s2390_s9, 10 }
  0x3b   : > { %s1382_s18 = sshll.u32 %s186_s13, 6  ;;  %s2609_s25 = scalar_lea.hbm %s3009_s6, %s1468_s15 }
  0x3c   : > { %s188_s20 = scalar_lea.vmem [#allocation13], %s1382_s18  ;;  %s2613_s27 = scalar_lea.sflag [#allocation9], %s184_s29 }
  0x3d   : > { %s195_s26 = sshll.u32 %s188_s20, 4  ;;  %s2204_s30 = scalar_lea.hbm %s2609_s25, 1024  ;;  %s2611_s26 = int_to_ptr.vmem [resolvable:$true] %s195_s26 }
  0x3e   : > { %p2205_p6 = scmp.ne.s32.totalorder %s2609_s25, %s2204_s30  ;;  %p2206_p3 = pneg %p2575_p5 }
  0x3f   : > { %s2209_s0 = scalar_lea.hbm %s3009_s6, 2048  ;;  %p2210_p9 = scmp.lt.s32.totalorder %s2609_s25, %s3009_s6 }
  0x40   : > { %p2207_p12 = pnand %p2206_p3, %p2205_p6  ;;  %p2211_p10 = scmp.lt.s32.totalorder %s2209_s0, %s2204_s30 }
  0x42   : > { %p2208_p2 = pneg %p2207_p12  ;;  %p2212_p0 = por %p2211_p10, %p2210_p9 }
  0x44   : > { %p2213_p4 = pnand %p2212_p0, %p2208_p2 }
  0x46   : > { %2216 = shalt.err (!%p2213_p4)
}
  0x47   : > { %s2217_s29 = scalar_lea.vmem %s2611_s26, 1024  ;;  %s2461_s15 = smov [#allocation13]  }
  0x48   : > { %p2218_p7 = scmp.ne.s32.totalorder %s2611_s26, %s2217_s29  ;;  %s2222_s18 = sshll.u32 %s2461_s15, 4  ;;  %s2223_s18 = int_to_ptr.vmem [resolvable:$false] %s2222_s18 }
  0x49   : > { %s2224_s19 = scalar_lea.vmem %s2223_s18, 2048  ;;  %p2225_p6 = scmp.lt.s32.totalorder %s2611_s26, %s2223_s18 }
  0x4a   : > { %p2220_p8 = pnand %p2218_p7, %p2206_p3  ;;  %p2226_p12 = scmp.lt.s32.totalorder %s2224_s19, %s2217_s29 }
  0x4c   : > { %p2221_p11 = pneg %p2220_p8  ;;  %p2227_p13 = por %p2226_p12, %p2225_p6 }
  0x4e   : > { %p2228_p1 = pnand %p2227_p13, %p2221_p11 }
  0x50   : > { %2231 = shalt.err (!%p2228_p1)
}
  0x51   : > { %1930 = dma.hbm_to_vmem [thread:$0]  (!%p2575_p5), %s2609_s25, 1024, %s2611_s26, %s2613_s27, %s2458_s23, %s2458_s23, %s2459_s24  }
  0x52   : > { %p3019_p3 = scmp.ne.s32.totalorder %s3016_s17, 0 }
  0x53   : > { %p3020_p2 = scmp.eq.s32.totalorder (!%p3019_p3), %s2531_s10, 0 }
  0x54   : > { %207 = sbr.rel (%p3019_p3) target bundleno = 872 (0x368), region = 36 }
  0x59   : > { %2359 = dma.done.wait (%p3020_p2), [#allocation9], 1024   ;;  %p3021_p9 = pmov %p3020_p2 }
  0x5a   : > { %p3022_p13 = pmov %p3020_p2 }
  0x5b   : > { %2361 = vsyncadd (%p3021_p9), [#allocation9], 4294966272 }
  0x5c   : > { %2363 = dma.done.wait (%p3022_p13), [#allocation12], 1024   ;;  %p3023_p1 = pmov %p3020_p2 }
  0x5d   : > { %s217_s21 = sand.u32 1, %s2531_s10   ;;  %s219_s23 = sand.u32 1, %s2382_s8  }
  0x5e   : > { %2365 = vsyncadd (%p3023_p1), [#allocation12], 4294966272  ;;  %s1388_s24 = sshll.u32 %s219_s23, 6  ;;  %s218_s17 = scalar_lea.sflag [#allocation9], %s217_s21 }
  0x5f   : > { %s2649_s22 = scalar_lea.vmem [#allocation13], %s1388_s24  ;;  %p3024_p5 = scmp.ne.s32.totalorder %s3015_s16, 0 }
  0x61   : > { %2367 = dma.done.wait (%p3024_p5), %s218_s17, 1024  }
  0x62   : > { %2369 = vsyncadd (%p3024_p5), %s218_s17, 4294966272  ;;  %v2655_v0 = vmov 0   ;;  %v2657_v1 = vmov 0   ;;  %v2659_v2 = vmov 0   ;;  %v2661_v3 = vmov 0   ;;  %p3025_p10 = scmp.ne.s32.totalorder %s2531_s10, 0 }
  0x63   : > { %v2663_v4 = vmov 0   ;;  %v2665_v5 = vmov 0   ;;  %v2667_v6 = vmov 0   ;;  %v2669_v7 = vmov 0  }
  0x64   : > { %v2671_v8 = vmov 0   ;;  %v2673_v9 = vmov 0   ;;  %v2675_v10 = vmov 0   ;;  %v2677_v11 = vmov 0   ;;  %245 = sbr.rel (%p3025_p10) target bundleno = 375 (0x177), region = 52 }
  0x65   : > { %v2679_v12 = vmov 0   ;;  %v2681_v13 = vmov 0   ;;  %v2683_v14 = vmov 0   ;;  %v2685_v15 = vmov 0  }
  0x69   : > { %s2462_s16 = smov [#allocation2]  }
  0x6a   : > { %s253_s25 = sshll.u32 %s2462_s16, 4  ;;  %s254_s25 = int_to_ptr.vmem [resolvable:$true] %s253_s25 }
  0x6b   : > { %s2240_s20 = scalar_lea.vmem %s254_s25, 1024  ;;  %p2245_p4 = scmp.lt.s32.totalorder %s254_s25, %s254_s25 }
  0x6c   : > { %p2241_p0 = scmp.ne.s32.totalorder %s254_s25, %s2240_s20  ;;  %p2246_p7 = scmp.lt.s32.totalorder %s2240_s20, %s2240_s20 }
  0x6e   : > { %p2247_p8 = por %p2246_p7, %p2245_p4 }
  0x70   : > { %p2248_p11 = pnand %p2247_p8, %p2241_p0 }
  0x72   : > { %2251 = shalt.err (!%p2248_p11)  }
  0x73   : > { %256 = dma.hbm_to_vmem [thread:$0]  %s3006_s3, 1024, %s254_s25, [#allocation15] }
  0x74   : > { %2370 = dma.done.wait [#allocation15], 1024 }
  0x75   : > { %2371 = vsyncadd [#allocation15], 4294966272  ;;  %v2108_v16 = vld [vmem:[#allocation11 + $0x38] sm:$0xff]   ;;  %v2109_v17 = vld [vmem:[#allocation11 + $0x30] sm:$0xff]   ;;  %v509_v32 = vlaneseq  ;;  %s526_s30 = sld [smem:[#allocation7]] }
  0x76   : > { %1729 = vmatprep.subr.bf16.mxu0 %v2108_v16  ;;  %1825 = vmatprep.subr.bf16.mxu1 %v2108_v16  ;;  %v2110_v18 = vld [vmem:[#allocation11 + $0x28] sm:$0xff]   ;;  %v2111_v19 = vld [vmem:[#allocation11 + $0x20] sm:$0xff]   ;;  %v2112_v22 = vld [vmem:[#allocation11 + $0x18] sm:$0xff]  }
  0x77   : > { %1730 = vmatpush3.bf16.msra.mxu0 %v2108_v16  ;;  %1833 = vmatpush3.bf16.msra.mxu1 %v2108_v16  ;;  %v2116_v20 = vld [vmem:[#allocation8] sm:$0xff]   ;;  %v2113_v23 = vld [vmem:[#allocation11 + $0x10] sm:$0xff]   ;;  %v2114_v24 = vld [vmem:[#allocation11 + $0x8] sm:$0xff]   ;;  %v2692_v33 = vshrl.u32 %v509_v32, 7 }
  0x78   : > { %1731 = vmatprep.subr.bf16.mxu0 %v2109_v17  ;;  %1826 = vmatprep.subr.bf16.mxu1 %v2109_v17  ;;  %v2117_v21 = vld [vmem:[#allocation8 + $0x20] sm:$0xff]   ;;  %v2118_v26 = vld [vmem:[#allocation8 + $0x8] sm:$0xff]   ;;  %v2120_v28 = vld [vmem:[#allocation8 + $0x10] sm:$0xff]  }
  0x79   : > { %1745 = vmatprep.mubr.bf16.mxu0 %v2116_v20  ;;  %1753 = vmatprep.mubr.bf16.mxu1 %v2117_v21  ;;  %v2115_v25 = vld [vmem:[#allocation11] sm:$0xff]   ;;  %v2119_v27 = vld [vmem:[#allocation8 + $0x28] sm:$0xff]   ;;  %v2121_v29 = vld [vmem:[#allocation8 + $0x30] sm:$0xff]   ;;  %v512_v35 = vadd.s32 16, %v2692_v33  ;;  %v520_v36 = vadd.s32 80, %v2692_v33  ;;  %v518_v38 = vadd.s32 64, %v2692_v33 }
  0x7a   : > { %v2122_v30 = vld [vmem:[#allocation8 + $0x18] sm:$0xff]   ;;  %v2697_v34 = vld [vmem:[%s3008_s5] ss:$0 sm:$0xff]  ;;  %v513_v41 = vadd.s32 24, %v2692_v33  ;;  %v521_v42 = vadd.s32 88, %v2692_v33  ;;  %v511_v45 = vadd.s32 8, %v2692_v33 }
  0x7b   : > { %1732 = vmatpush3.bf16.msra.mxu0 %v2109_v17  ;;  %1834 = vmatpush3.bf16.msra.mxu1 %v2109_v17  ;;  %v2123_v31 = vld [vmem:[#allocation8 + $0x38] sm:$0xff]   ;;  %v2701_v37 = vstv %s526_s30  ;;  %v519_v46 = vadd.s32 72, %v2692_v33  ;;  %v2713_v49 = vadd.s32 48, %v2692_v33  ;;  %v2725_v56 = vadd.s32 112, %v2692_v33 }
  0x7c   : > { %1733 = vmatprep.subr.bf16.mxu0 %v2110_v18  ;;  %1827 = vmatprep.subr.bf16.mxu1 %v2110_v18  ;;  %vm530_vm0 = vcmp.lt.s32.totalorder %v512_v35, %v2701_v37  ;;  %vm538_vm1 = vcmp.lt.s32.totalorder %v520_v36, %v2701_v37  ;;  %vm528_vm2 = vcmp.lt.s32.totalorder %v2692_v33, %v2701_v37  ;;  %v2728_v57 = vadd.s32 32, %v2692_v33 }
  0x7d   : > { %vm536_vm3 = vcmp.lt.s32.totalorder %v518_v38, %v2701_v37  ;;  %vm531_vm4 = vcmp.lt.s32.totalorder %v513_v41, %v2701_v37  ;;  %vm539_vm5 = vcmp.lt.s32.totalorder %v521_v42, %v2701_v37  ;;  %vm529_vm6 = vcmp.lt.s32.totalorder %v511_v45, %v2701_v37 }
  0x7e   : > { %vm537_vm7 = vcmp.lt.s32.totalorder %v519_v46, %v2701_v37  ;;  %vm534_vm8 = vcmp.lt.s32.totalorder %v2713_v49, %v2701_v37  ;;  %v517_v2 = vadd.s32 56, %v2692_v33  ;;  %v525_v3 = vadd.s32 120, %v2692_v33 }
  0x7f   : > { %1734 = vmatpush3.bf16.msra.mxu0 %v2110_v18  ;;  %1835 = vmatpush3.bf16.msra.mxu1 %v2110_v18  ;;  %vm542_vm9 = vcmp.lt.s32.totalorder %v2725_v56, %v2701_v37  ;;  %vm532_vm10 = vcmp.lt.s32.totalorder %v2728_v57, %v2701_v37  ;;  %v522_v35 = vadd.s32 96, %v2692_v33  ;;  %v523_v46 = vadd.s32 104, %v2692_v33 }
  0x80   : > { %1735 = vmatprep.subr.bf16.mxu0 %v2111_v19  ;;  %1828 = vmatprep.subr.bf16.mxu1 %v2111_v19  ;;  %vm535_vm11 = vcmp.lt.s32.totalorder %v517_v2, %v2701_v37  ;;  %vm543_vm12 = vcmp.lt.s32.totalorder %v525_v3, %v2701_v37 }
  0x81   : > { %vm540_vm13 = vcmp.lt.s32.totalorder %v522_v35, %v2701_v37  ;;  %vm541_vm15 = vcmp.lt.s32.totalorder %v523_v46, %v2701_v37 }
  0x83   : > { %1736 = vmatpush3.bf16.msra.mxu0 %v2111_v19  ;;  %1836 = vmatpush3.bf16.msra.mxu1 %v2111_v19 }
  0x84   : > { %1737 = vmatprep.subr.bf16.mxu0 %v2112_v22  ;;  %1829 = vmatprep.subr.bf16.mxu1 %v2112_v22 }
  0x87   : > { %1738 = vmatpush3.bf16.msra.mxu0 %v2112_v22  ;;  %1837 = vmatpush3.bf16.msra.mxu1 %v2112_v22 }
  0x88   : > { %1739 = vmatprep.subr.bf16.mxu0 %v2113_v23  ;;  %1830 = vmatprep.subr.bf16.mxu1 %v2113_v23 }
  0x8b   : > { %1740 = vmatpush3.bf16.msra.mxu0 %v2113_v23  ;;  %1838 = vmatpush3.bf16.msra.mxu1 %v2113_v23 }
  0x8c   : > { %1741 = vmatprep.subr.bf16.mxu0 %v2114_v24  ;;  %1831 = vmatprep.subr.bf16.mxu1 %v2114_v24 }
  0x8f   : > { %1742 = vmatpush3.bf16.msra.mxu0 %v2114_v24  ;;  %1839 = vmatpush3.bf16.msra.mxu1 %v2114_v24 }
  0x90   : > { %1743 = vmatprep.subr.bf16.mxu0 %v2115_v25  ;;  %1832 = vmatprep.subr.bf16.mxu1 %v2115_v25 }
  0x93   : > { %1744 = vmatpush3.bf16.msra.mxu0 %v2115_v25  ;;  %1840 = vmatpush3.bf16.msra.mxu1 %v2115_v25 }
  0x96   : > { %1746 = vmatmul.mubr.bf16.vlgmr.msra.gmra.mxu0 %v2118_v26  ;;  %1754 = vmatmul.mubr.bf16.vlgmr.msra.gmra.mxu1 %v2119_v27 }
  0x97   : > { %1749 = vmatprep.mubr.bf16.mxu0 %v2120_v28  ;;  %1757 = vmatprep.mubr.bf16.mxu1 %v2121_v29 }
  0x9e   : > { %1750 = vmatmul.mubr.bf16.gmra.mxu0 %v2122_v30  ;;  %1758 = vmatmul.mubr.bf16.gmra.mxu1 %v2123_v31 }
 0x156   : > { %v1747_v39 = vpop.f32.mrf.mxu0  ;;  %v1755_v40 = vpop.f32.mrf.mxu1 }
 0x157   : > { %v439_v43 = vadd.f32 %v1747_v39, %v2697_v34  ;;  %v471_v44 = vadd.f32 %v1755_v40, %v2697_v34 }
 0x158   : > { %v430_v47 = vpop.f32.mrf.mxu0  ;;  %v462_v48 = vpop.f32.mrf.mxu1 }
 0x159   : > { %v431_v50 = vadd.f32 %v2697_v34, %v430_v47  ;;  %v463_v51 = vadd.f32 %v2697_v34, %v462_v48  ;;  %v495_v52 = vmax.f32 %v439_v43, 0.0  ;;  %v503_v53 = vmax.f32 %v471_v44, 0.0 }
 0x15a   : > { %v1748_v54 = vpop.f32.mrf.mxu0  ;;  %v1756_v55 = vpop.f32.mrf.mxu1  ;;  %v515_v44 = vadd.s32 40, %v2692_v33 }
 0x15b   : > { %v493_v58 = vmax.f32 %v431_v50, 0.0  ;;  %v501_v59 = vmax.f32 %v463_v51, 0.0  ;;  %v442_v60 = vadd.f32 %v1748_v54, %v2697_v34  ;;  %v474_v61 = vadd.f32 %v1756_v55, %v2697_v34 }
 0x15c   : > { %v433_v62 = vpop.f32.mrf.mxu0  ;;  %v465_v63 = vpop.f32.mrf.mxu1  ;;  %v546_v4 = vsel %vm530_vm0, %v495_v52, 0.0  ;;  %v554_v5 = vsel %vm538_vm1, %v503_v53, 0.0  ;;  %vm533_vm14 = vcmp.lt.s32.totalorder %v515_v44, %v2701_v37 }
 0x15d   : > { %v434_v0 = vadd.f32 %v2697_v34, %v433_v62  ;;  %v466_v1 = vadd.f32 %v2697_v34, %v465_v63  ;;  %v496_v6 = vmax.f32 %v442_v60, 0.0  ;;  %v504_v7 = vmax.f32 %v474_v61, 0.0 }
 0x15e   : > { %v1751_v8 = vpop.f32.mrf.mxu0  ;;  %v1759_v9 = vpop.f32.mrf.mxu1  ;;  %v544_v14 = vsel %vm528_vm2, %v493_v58, 0.0  ;;  %v552_v15 = vsel %vm536_vm3, %v501_v59, 0.0 }
 0x15f   : > { %v494_v10 = vmax.f32 %v434_v0, 0.0  ;;  %v502_v11 = vmax.f32 %v466_v1, 0.0  ;;  %v455_v12 = vadd.f32 %v1751_v8, %v2697_v34  ;;  %v487_v13 = vadd.f32 %v1759_v9, %v2697_v34 }
 0x160   : > { %v547_v16 = vsel %vm531_vm4, %v496_v6, 0.0  ;;  %v555_v17 = vsel %vm539_vm5, %v504_v7, 0.0  ;;  %v446_v18 = vpop.f32.mrf.mxu0  ;;  %v478_v19 = vpop.f32.mrf.mxu1 }
 0x161   : > { %v1509_v20 = vpack.c.bf16 %v547_v16, %v546_v4  ;;  %v1529_v21 = vpack.c.bf16 %v555_v17, %v554_v5  ;;  %v545_v22 = vsel %vm529_vm6, %v494_v10, 0.0  ;;  %v553_v23 = vsel %vm537_vm7, %v502_v11, 0.0 }
 0x162   : > { %v1504_v24 = vpack.c.bf16 %v545_v22, %v544_v14  ;;  %v1524_v25 = vpack.c.bf16 %v553_v23, %v552_v15  ;;  %v499_v26 = vmax.f32 %v455_v12, 0.0  ;;  %v1752_v27 = vpop.f32.mrf.mxu0  ;;  %v1760_v28 = vpop.f32.mrf.mxu1  ;;  %v507_v29 = vmax.f32 %v487_v13, 0.0 }
 0x163   : > { %1653 = vst [vmem:[#allocation3 + $0x8] sm:$0xff] %v1509_v20   ;;  %1657 = vst [vmem:[#allocation3 + $0x28] sm:$0xff] %v1529_v21   ;;  %v447_v30 = vadd.f32 %v2697_v34, %v446_v18  ;;  %v458_v31 = vadd.f32 %v1752_v27, %v2697_v34  ;;  %v490_v32 = vadd.f32 %v1760_v28, %v2697_v34 }
 0x164   : > { %1505 = vst [vmem:[#allocation3] sm:$0xff] %v1504_v24   ;;  %1656 = vst [vmem:[#allocation3 + $0x20] sm:$0xff] %v1524_v25   ;;  %v449_v36 = vpop.f32.mrf.mxu0  ;;  %v481_v38 = vpop.f32.mrf.mxu1  ;;  %v479_v40 = vadd.f32 %v2697_v34, %v478_v19  ;;  %v550_v47 = vsel %vm534_vm8, %v499_v26, 0.0  ;;  %v558_v48 = vsel %vm542_vm9, %v507_v29, 0.0 }
 0x165   : > { %v497_v39 = vmax.f32 %v447_v30, 0.0  ;;  %v500_v41 = vmax.f32 %v458_v31, 0.0  ;;  %v508_v42 = vmax.f32 %v490_v32, 0.0  ;;  %v450_v43 = vadd.f32 %v2697_v34, %v449_v36 }
 0x166   : > { %v482_v45 = vadd.f32 %v2697_v34, %v481_v38  ;;  %v505_v55 = vmax.f32 %v479_v40, 0.0 }
 0x167   : > { %v551_v50 = vsel %vm535_vm11, %v500_v41, 0.0  ;;  %v559_v51 = vsel %vm543_vm12, %v508_v42, 0.0  ;;  %v548_v54 = vsel %vm532_vm10, %v497_v39, 0.0  ;;  %v498_v34 = vmax.f32 %v450_v43, 0.0 }
 0x168   : > { %v1519_v52 = vpack.c.bf16 %v551_v50, %v550_v47  ;;  %v1539_v53 = vpack.c.bf16 %v559_v51, %v558_v48  ;;  %v506_v58 = vmax.f32 %v482_v45, 0.0  ;;  %v556_v33 = vsel %vm540_vm13, %v505_v55, 0.0 }
 0x169   : > { %v549_v49 = vsel %vm533_vm14, %v498_v34, 0.0 }
 0x16a   : > { %v642_v13 = vld [vmem:[#allocation3 + $0x8] sm:$0xf]   ;;  %v643_v12 = vld [vmem:[#allocation3 + $0xc] sm:$0xf]   ;;  %1655 = vst [vmem:[#allocation3 + $0x18] sm:$0xff] %v1519_v52   ;;  %1659 = vst [vmem:[#allocation3 + $0x38] sm:$0xff] %v1539_v53   ;;  %v1514_v57 = vpack.c.bf16 %v549_v49, %v548_v54 }
 0x16b   : > { %v650_v5 = vld [vmem:[#allocation3 + $0x28] sm:$0xf]   ;;  %v651_v4 = vld [vmem:[#allocation3 + $0x2c] sm:$0xf]   ;;  %v640_v15 = vld [vmem:[#allocation3] sm:$0xf]  }
 0x16c   : > { %v641_v14 = vld [vmem:[#allocation3 + $0x4] sm:$0xf]   ;;  %v648_v7 = vld [vmem:[#allocation3 + $0x20] sm:$0xf]   ;;  %v557_v56 = vsel %vm541_vm15, %v506_v58, 0.0  ;;  %1654 = vst [vmem:[#allocation3 + $0x10] sm:$0xff] %v1514_v57  }
 0x16d   : > { %v649_v6 = vld [vmem:[#allocation3 + $0x24] sm:$0xf]   ;;  %v1534_v59 = vpack.c.bf16 %v557_v56, %v556_v33 }
 0x16f   : > { %1658 = vst [vmem:[#allocation3 + $0x30] sm:$0xff] %v1534_v59  }
 0x171   : > { %v646_v9 = vld [vmem:[#allocation3 + $0x18] sm:$0xf]   ;;  %v647_v8 = vld [vmem:[#allocation3 + $0x1c] sm:$0xf]  }
 0x172   : > { %v654_v1 = vld [vmem:[#allocation3 + $0x38] sm:$0xf]   ;;  %v655_v0 = vld [vmem:[#allocation3 + $0x3c] sm:$0xf]  }
 0x173   : > { %v644_v11 = vld [vmem:[#allocation3 + $0x10] sm:$0xf]   ;;  %v645_v10 = vld [vmem:[#allocation3 + $0x14] sm:$0xf]  }
 0x176   : > { %v652_v3 = vld [vmem:[#allocation3 + $0x30] sm:$0xf]   ;;  %v653_v2 = vld [vmem:[#allocation3 + $0x34] sm:$0xf]  }
 0x177 PF: > { %v689_v37 = vld [vmem:[#allocation4 + $0x38] sm:$0xf]  ;;  %p3026_p6 = scmp.ne.s32.totalorder %s2531_s10, 0  ;;  %v690_v60 = vld [vmem:[#allocation4 + $0x3c] sm:$0xf]  ;;  %v2124_v19 = vld [vmem:[#allocation2] sm:$0xff]   ;;  %v2454_v15 = vphi %v2685_v15, %v640_v15   ;;  %v2450_v14 = vphi %v2683_v14, %v641_v14   ;;  %v2446_v13 = vphi %v2681_v13, %v642_v13   ;;  %v2442_v12 = vphi %v2679_v12, %v643_v12   ;;  %v2438_v11 = vphi %v2677_v11, %v644_v11   ;;  %v2434_v10 = vphi %v2675_v10, %v645_v10   ;;  %v2430_v9 = vphi %v2673_v9, %v646_v9   ;;  %v2426_v8 = vphi %v2671_v8, %v647_v8   ;;  %v2422_v7 = vphi %v2669_v7, %v648_v7   ;;  %v2418_v6 = vphi %v2667_v6, %v649_v6   ;;  %v2414_v5 = vphi %v2665_v5, %v650_v5   ;;  %v2410_v4 = vphi %v2663_v4, %v651_v4   ;;  %v2406_v3 = vphi %v2661_v3, %v652_v3   ;;  %v2402_v2 = vphi %v2659_v2, %v653_v2   ;;  %v2398_v1 = vphi %v2657_v1, %v654_v1   ;;  %v2394_v0 = vphi %v2655_v0, %v655_v0  }
 0x178   : > { %v687_v61 = vld [vmem:[#allocation4 + $0x30] sm:$0xf]  ;;  %v688_v62 = vld [vmem:[#allocation4 + $0x34] sm:$0xf]  ;;  %v685_v17 = vld [vmem:[#allocation4 + $0x28] sm:$0xf]  ;;  %1777 = vmatprep.mubr.bf16.mxu0 %v2124_v19 }
 0x179   : > { %s1852_s0 = scalar_select %p3026_p6, 1, 0  ;;  %v686_v18 = vld [vmem:[#allocation4 + $0x2c] sm:$0xf]  ;;  %v683_v26 = vld [vmem:[#allocation4 + $0x20] sm:$0xf] }
 0x17a   : > { %v681_v29 = vld [vmem:[#allocation4 + $0x18] sm:$0xf]  ;;  %v682_v30 = vld [vmem:[#allocation4 + $0x1c] sm:$0xf]  ;;  %v679_v31 = vld [vmem:[#allocation4 + $0x10] sm:$0xf] }
 0x17b   : > { %v1853_v63 = vstv %s1852_s0  ;;  %v2132_v36 = vld [vmem:[%s2649_s22 + $0x38] sm:$0xff]   ;;  %v2133_v38 = vld [vmem:[%s2649_s22 + $0x30] sm:$0xff]   ;;  %v678_v39 = vld [vmem:[#allocation4 + $0xc] sm:$0xf]  ;;  %s707_s12 = sld [smem:[#allocation6 + %s2531_s10]]  ;;  %p1463_p12 = scmp.ne.s32.totalorder %s2531_s10, 1 }
 0x17c   : > { %vm2842_vm0 = vcmp.ne.s32.totalorder %v1853_v63, 0  ;;  %1793 = vmatprep.subr.bf16.mxu1 %v2132_v36  ;;  %v675_v44 = vld [vmem:[#allocation4] sm:$0xf]  ;;  %v676_v45 = vld [vmem:[#allocation4 + $0x4] sm:$0xf]  ;;  %v2136_v47 = vld [vmem:[%s2649_s22 + $0x18] sm:$0xff]  }
 0x17d   : > { %v1911_v20 = vsel %vm2842_vm0, %v689_v37, %v2398_v1  ;;  %v1915_v21 = vsel %vm2842_vm0, %v690_v60, %v2394_v0  ;;  %v1903_v22 = vsel %vm2842_vm0, %v687_v61, %v2406_v3  ;;  %v1907_v23 = vsel %vm2842_vm0, %v688_v62, %v2402_v2  ;;  %v684_v1 = vld [vmem:[#allocation4 + $0x24] sm:$0xf]  ;;  %1794 = vmatpush3.bf16.msra.mxu1 %v2132_v36  ;;  %v2125_v48 = vld [vmem:[#allocation2 + $0x8] sm:$0xff]   ;;  %v2126_v50 = vld [vmem:[#allocation2 + $0x10] sm:$0xff]  }
 0x17e   : > { %v1438_v24 = vcombine.low %v1911_v20, %v1915_v21  ;;  %v1437_v25 = vcombine.low %v1903_v22, %v1907_v23  ;;  %v1895_v27 = vsel %vm2842_vm0, %v685_v17, %v2414_v5  ;;  %v1899_v28 = vsel %vm2842_vm0, %v686_v18, %v2410_v4  ;;  %v680_v4 = vld [vmem:[#allocation4 + $0x14] sm:$0xf]  ;;  %1795 = vmatprep.subr.bf16.mxu1 %v2133_v38  ;;  %v2129_v51 = vld [vmem:[#allocation2 + $0x28] sm:$0xff]   ;;  %v2131_v53 = vld [vmem:[#allocation2 + $0x38] sm:$0xff]  }
 0x17f   : > { %v1436_v0 = vcombine.low %v1895_v27, %v1899_v28  ;;  %v1887_v2 = vsel %vm2842_vm0, %v683_v26, %v2422_v7  ;;  %v1891_v3 = vsel %vm2842_vm0, %v684_v1, %v2418_v6  ;;  %v1879_v32 = vsel %vm2842_vm0, %v681_v29, %v2430_v9  ;;  %v677_v7 = vld [vmem:[#allocation4 + $0x8] sm:$0xf]  ;;  %v2130_v52 = vld [vmem:[#allocation2 + $0x30] sm:$0xff]   ;;  %v2139_v34 = vld [vmem:[%s2649_s22] sm:$0xff]  }
 0x180   : > { %1761 = vmatprep.subr.bf16.mxu0 %v1438_v24  ;;  %v1435_v5 = vcombine.low %v1887_v2, %v1891_v3  ;;  %v1883_v35 = vsel %vm2842_vm0, %v682_v30, %v2426_v8  ;;  %v1871_v40 = vsel %vm2842_vm0, %v679_v31, %v2438_v11  ;;  %v1875_v41 = vsel %vm2842_vm0, %v680_v4, %v2434_v10  ;;  %v2134_v9 = vld [vmem:[%s2649_s22 + $0x28] sm:$0xff]   ;;  %v2135_v11 = vld [vmem:[%s2649_s22 + $0x20] sm:$0xff]   ;;  %v2137_v54 = vld [vmem:[%s2649_s22 + $0x10] sm:$0xff]  }
 0x181   : > { %1762 = vmatpush3.bf16.msra.mxu0 %v1438_v24  ;;  %v1434_v6 = vcombine.low %v1879_v32, %v1883_v35  ;;  %v1433_v8 = vcombine.low %v1871_v40, %v1875_v41  ;;  %1796 = vmatpush3.bf16.msra.mxu1 %v2133_v38  ;;  %v1863_v42 = vsel %vm2842_vm0, %v677_v7, %v2446_v13  ;;  %v2138_v55 = vld [vmem:[%s2649_s22 + $0x8] sm:$0xff]   ;;  %v1542_v58 = vld [vmem:[#allocation3] sm:$0xff]   ;;  %v1661_v19 = vld [vmem:[#allocation3 + $0x10] sm:$0xff]  }
 0x182   : > { %1763 = vmatprep.subr.bf16.mxu0 %v1437_v25  ;;  %v1867_v43 = vsel %vm2842_vm0, %v678_v39, %v2442_v12  ;;  %1797 = vmatprep.subr.bf16.mxu1 %v2134_v9  ;;  %v1855_v46 = vsel %vm2842_vm0, %v675_v44, %v2454_v15  ;;  %v1859_v13 = vsel %vm2842_vm0, %v676_v45, %v2450_v14  ;;  %v2127_v15 = vld [vmem:[#allocation2 + $0x18] sm:$0xff]   ;;  %v2128_v14 = vld [vmem:[#allocation2 + $0x20] sm:$0xff]   ;;  %v1660_v33 = vld [vmem:[#allocation3 + $0x8] sm:$0xff]   ;;  %v1543_v57 = vunpack.c.l.bf16 %v1542_v58 }
 0x183   : > { %v1432_v10 = vcombine.low %v1863_v42, %v1867_v43  ;;  %v1431_v12 = vcombine.low %v1855_v46, %v1859_v13  ;;  %v1548_v56 = vunpack.c.h.bf16 %v1660_v33  ;;  %v1544_v59 = vunpack.c.h.bf16 %v1542_v58  ;;  %v1662_v24 = vld [vmem:[#allocation3 + $0x18] sm:$0xff]   ;;  %v1663_v7 = vld [vmem:[#allocation3 + $0x20] sm:$0xff]  }
 0x184   : > { %v1547_v37 = vunpack.c.l.bf16 %v1660_v33  ;;  %v965_v63 = vmul.f32 0.1, %v1543_v57  ;;  %v1551_v27 = vunpack.c.l.bf16 %v1661_v19  ;;  %v1556_v28 = vunpack.c.h.bf16 %v1662_v24 }
 0x185   : > { %1764 = vmatpush3.bf16.msra.mxu0 %v1437_v25  ;;  %1798 = vmatpush3.bf16.msra.mxu1 %v2134_v9  ;;  %v968_v62 = vmul.f32 0.1, %v1548_v56  ;;  %v966_v16 = vmul.f32 0.1, %v1544_v59  ;;  %v1552_v1 = vunpack.c.h.bf16 %v1661_v19  ;;  %v1555_v29 = vunpack.c.l.bf16 %v1662_v24  ;;  %v1666_v56 = vld [vmem:[#allocation3 + $0x38] sm:$0xff]  }
 0x186   : > { %1765 = vmatprep.subr.bf16.mxu0 %v1436_v0  ;;  %1799 = vmatprep.subr.bf16.mxu1 %v2135_v11  ;;  %v967_v21 = vmul.f32 0.1, %v1547_v37  ;;  %v969_v31 = vmul.f32 0.1, %v1551_v27  ;;  %v972_v32 = vmul.f32 0.1, %v1556_v28  ;;  %v1560_v45 = vunpack.c.h.bf16 %v1663_v7 }
 0x187   : > { %v970_v35 = vmul.f32 0.1, %v1552_v1  ;;  %v971_v40 = vmul.f32 0.1, %v1555_v29 }
 0x189   : > { %1766 = vmatpush3.bf16.msra.mxu0 %v1436_v0  ;;  %1800 = vmatpush3.bf16.msra.mxu1 %v2135_v11  ;;  %v1559_v11 = vunpack.c.l.bf16 %v1663_v7 }
 0x18a   : > { %1767 = vmatprep.subr.bf16.mxu0 %v1435_v5  ;;  %1801 = vmatprep.subr.bf16.mxu1 %v2136_v47 }
 0x18d   : > { %1768 = vmatpush3.bf16.msra.mxu0 %v1435_v5  ;;  %1802 = vmatpush3.bf16.msra.mxu1 %v2136_v47 }
 0x18e   : > { %1769 = vmatprep.subr.bf16.mxu0 %v1434_v6  ;;  %1803 = vmatprep.subr.bf16.mxu1 %v2137_v54 }
 0x191   : > { %1770 = vmatpush3.bf16.msra.mxu0 %v1434_v6  ;;  %1804 = vmatpush3.bf16.msra.mxu1 %v2137_v54 }
 0x192   : > { %1771 = vmatprep.subr.bf16.mxu0 %v1433_v8  ;;  %1805 = vmatprep.subr.bf16.mxu1 %v2138_v55 }
 0x195   : > { %1772 = vmatpush3.bf16.msra.mxu0 %v1433_v8  ;;  %1806 = vmatpush3.bf16.msra.mxu1 %v2138_v55  ;;  %v1664_v8 = vld [vmem:[#allocation3 + $0x28] sm:$0xff]   ;;  %v1665_v55 = vld [vmem:[#allocation3 + $0x30] sm:$0xff]  }
 0x196   : > { %1773 = vmatprep.subr.bf16.mxu0 %v1432_v10  ;;  %1807 = vmatprep.subr.bf16.mxu1 %v2139_v34  ;;  %v1564_v44 = vunpack.c.h.bf16 %v1664_v8  ;;  %v1563_v47 = vunpack.c.l.bf16 %v1664_v8  ;;  %v1567_v37 = vunpack.c.l.bf16 %v1665_v55 }
 0x198   : > { %v975_v58 = vmul.f32 0.1, %v1563_v47 }
 0x199   : > { %1774 = vmatpush3.bf16.msra.mxu0 %v1432_v10  ;;  %1808 = vmatpush3.bf16.msra.mxu1 %v2139_v34 }
 0x19a   : > { %1775 = vmatprep.subr.bf16.mxu0 %v1431_v12 }
 0x19d   : > { %1776 = vmatpush3.bf16.msra.mxu0 %v1431_v12 }
 0x1a0   : > { %1778 = vmatmul.mubr.bf16.vlgmr.msra.gmra.mxu0 %v2125_v48 }
 0x1a1   : > { %1781 = vmatprep.mubr.bf16.mxu0 %v2126_v50  ;;  %v973_v50 = vmul.f32 0.1, %v1559_v11 }
 0x1a8   : > { %1782 = vmatmul.mubr.bf16.gmra.mxu0 %v2127_v15 }
 0x1a9   : > { %1785 = vmatprep.mubr.bf16.mxu0 %v2128_v14  ;;  %v976_v14 = vmul.f32 0.1, %v1564_v44 }
 0x1b0   : > { %1786 = vmatmul.mubr.bf16.gmra.mxu0 %v2129_v51  ;;  %v974_v51 = vmul.f32 0.1, %v1560_v45 }
 0x1b1   : > { %1789 = vmatprep.mubr.bf16.mxu0 %v2130_v52 }
 0x1b8   : > { %1790 = vmatmul.mubr.bf16.gmra.mxu0 %v2131_v53 }
 0x260   : > { %v1779_v49 = vpop.f32.mrf.mxu0 }
 0x261   : > { %v919_v20 = vmul.f32 0.9, %v1779_v49 }
 0x262   : > { %v854_v60 = vpop.f32.mrf.mxu0 }
 0x263   : > { %v917_v17 = vmul.f32 0.9, %v854_v60  ;;  %v2896_v3 = vadd.f32 %v967_v21, %v919_v20  ;;  %v1572_v60 = vunpack.c.h.bf16 %v1666_v56  ;;  %v977_v20 = vmul.f32 0.1, %v1567_v37 }
 0x264   : > { %v1780_v61 = vpop.f32.mrf.mxu0 }
 0x265   : > { %v920_v18 = vmul.f32 0.9, %v1780_v61  ;;  %v2892_v0 = vadd.f32 %v965_v63, %v917_v17  ;;  %v1568_v63 = vunpack.c.h.bf16 %v1665_v55  ;;  %v1571_v17 = vunpack.c.l.bf16 %v1666_v56 }
 0x266   : > { %v857_v22 = vpop.f32.mrf.mxu0 }
 0x267   : > { %v918_v23 = vmul.f32 0.9, %v857_v22  ;;  %v2890_v25 = vadd.f32 %v968_v62, %v920_v18  ;;  %v980_v22 = vmul.f32 0.1, %v1572_v60  ;;  %v978_v27 = vmul.f32 0.1, %v1568_v63 }
 0x268   : > { %v1783_v26 = vpop.f32.mrf.mxu0  ;;  %v979_v1 = vmul.f32 0.1, %v1571_v17 }
 0x269   : > { %v2894_v2 = vadd.f32 %v966_v16, %v918_v23  ;;  %v998_v36 = vpack.c.bf16 %v2890_v25, %v2896_v3  ;;  %v923_v39 = vmul.f32 0.9, %v1783_v26 }
 0x26a   : > { %v870_v30 = vpop.f32.mrf.mxu0 }
 0x26b   : > { %v997_v5 = vpack.c.bf16 %v2894_v2, %v2892_v0  ;;  %v921_v38 = vmul.f32 0.9, %v870_v30  ;;  %v2908_v13 = vadd.f32 %v971_v40, %v923_v39 }
 0x26c   : > { %v1784_v4 = vpop.f32.mrf.mxu0 }
 0x26d   : > { %v924_v6 = vmul.f32 0.9, %v1784_v4  ;;  %1809 = vmatprep.mubr.bf16.mxu1 %v997_v5  ;;  %v2904_v10 = vadd.f32 %v969_v31, %v921_v38  ;;  %v2939_v38 = vstv %s707_s12 }
 0x26e   : > { %v873_v41 = vpop.f32.mrf.mxu0  ;;  %1810 = vmatmul.mubr.bf16.vlgmr.msra.gmra.mxu1 %v998_v36  ;;  %v1024_v7 = vmul.f32 %v2939_v38, %v2896_v3  ;;  %v1023_v44 = vmul.f32 %v2939_v38, %v2894_v2 }
 0x26f   : > { %v922_v9 = vmul.f32 0.9, %v873_v41  ;;  %v2902_v42 = vadd.f32 %v972_v32, %v924_v6  ;;  %v1022_v41 = vmul.f32 %v2939_v38, %v2892_v0  ;;  %v1028_v0 = vmul.f32 %v2939_v38, %v2908_v13 }
 0x270   : > { %v1787_v43 = vpop.f32.mrf.mxu0  ;;  %v1026_v2 = vmul.f32 %v2939_v38, %v2904_v10 }
 0x271   : > { %v2906_v46 = vadd.f32 %v970_v35, %v922_v9  ;;  %v1000_v52 = vpack.c.bf16 %v2902_v42, %v2908_v13  ;;  %v927_v34 = vmul.f32 0.9, %v1787_v43  ;;  %v1025_v9 = vmul.f32 %v2939_v38, %v2890_v25 }
 0x272   : > { %v886_v12 = vpop.f32.mrf.mxu0 }
 0x273   : > { %v999_v48 = vpack.c.bf16 %v2906_v46, %v2904_v10  ;;  %v925_v53 = vmul.f32 0.9, %v886_v12  ;;  %v2920_v16 = vadd.f32 %v975_v58, %v927_v34  ;;  %v1027_v58 = vmul.f32 %v2939_v38, %v2906_v46 }
 0x274   : > { %v1788_v15 = vpop.f32.mrf.mxu0 }
 0x275   : > { %v928_v54 = vmul.f32 0.9, %v1788_v15  ;;  %1813 = vmatprep.mubr.bf16.mxu1 %v999_v48  ;;  %v2916_v61 = vadd.f32 %v973_v50, %v925_v53  ;;  %v1029_v53 = vmul.f32 %v2939_v38, %v2902_v42  ;;  %v1032_v10 = vmul.f32 %v2939_v38, %v2920_v16 }
 0x276   : > { %v889_v33 = vpop.f32.mrf.mxu0  ;;  %1814 = vmatmul.mubr.bf16.gmra.mxu1 %v1000_v52 }
 0x277   : > { %v926_v49 = vmul.f32 0.9, %v889_v33  ;;  %v2914_v57 = vadd.f32 %v976_v14, %v928_v54 }
 0x278   : > { %v1791_v59 = vpop.f32.mrf.mxu0 }
 0x279   : > { %v2918_v62 = vadd.f32 %v974_v51, %v926_v49  ;;  %v1002_v23 = vpack.c.bf16 %v2914_v57, %v2920_v16  ;;  %v931_v28 = vmul.f32 0.9, %v1791_v59  ;;  %v1033_v46 = vmul.f32 %v2939_v38, %v2914_v57 }
 0x27a   : > { %v902_v18 = vpop.f32.mrf.mxu0 }
 0x27b   : > { %v1001_v19 = vpack.c.bf16 %v2918_v62, %v2916_v61  ;;  %v929_v24 = vmul.f32 0.9, %v902_v18  ;;  %v2932_v32 = vadd.f32 %v979_v1, %v931_v28 }
 0x27c   : > { %v1792_v21 = vpop.f32.mrf.mxu0 }
 0x27d   : > { %v932_v26 = vmul.f32 0.9, %v1792_v21  ;;  %1817 = vmatprep.mubr.bf16.mxu1 %v1001_v19  ;;  %v2928_v31 = vadd.f32 %v977_v20, %v929_v24  ;;  %v1030_v19 = vmul.f32 %v2939_v38, %v2916_v61  ;;  %v1036_v61 = vmul.f32 %v2939_v38, %v2932_v32 }
 0x27e   : > { %v905_v29 = vpop.f32.mrf.mxu0  ;;  %1818 = vmatmul.mubr.bf16.gmra.mxu1 %v1002_v23  ;;  %v1031_v23 = vmul.f32 %v2939_v38, %v2918_v62 }
 0x27f   : > { %v930_v30 = vmul.f32 0.9, %v905_v29  ;;  %v2926_v5 = vadd.f32 %v980_v22, %v932_v26 }
 0x281   : > { %v2930_v4 = vadd.f32 %v978_v27, %v930_v30  ;;  %v1004_v36 = vpack.c.bf16 %v2926_v5, %v2932_v32  ;;  %v1037_v62 = vmul.f32 %v2939_v38, %v2926_v5 }
 0x283   : > { %v1003_v35 = vpack.c.bf16 %v2930_v4, %v2928_v31 }
 0x285   : > { %1821 = vmatprep.mubr.bf16.mxu1 %v1003_v35 }
 0x286   : > { %1822 = vmatmul.mubr.bf16.gmra.mxu1 %v1004_v36 }
 0x32e   : > { %v1811_v6 = vpop.f32.mrf.mxu1 }
 0x32f   : > { %v1129_v40 = vadd.f32 %v1811_v6, %v1024_v7  ;;  %v1034_v6 = vmul.f32 %v2939_v38, %v2928_v31 }
 0x330   : > { %v1120_v39 = vpop.f32.mrf.mxu1 }
 0x331   : > { %v1121_v43 = vadd.f32 %v1120_v39, %v1022_v41  ;;  %v1185_v47 = vmax.f32 %v1129_v40, 0.0  ;;  %v1035_v41 = vmul.f32 %v2939_v38, %v2930_v4 }
 0x332   : > { %v1812_v8 = vpop.f32.mrf.mxu1 }
 0x333   : > { %v1132_v11 = vadd.f32 %v1812_v8, %v1025_v9  ;;  %v1183_v3 = vmax.f32 %v1121_v43, 0.0 }
 0x334   : > { %v1123_v45 = vpop.f32.mrf.mxu1 }
 0x335   : > { %v1186_v12 = vmax.f32 %v1132_v11, 0.0  ;;  %v1124_v48 = vadd.f32 %v1123_v45, %v1023_v44 }
 0x336   : > { %v1815_v50 = vpop.f32.mrf.mxu1 }
 0x337   : > { %v2949_v15 = vpack.c.bf16 %v1186_v12, %v1185_v47  ;;  %v1184_v14 = vmax.f32 %v1124_v48, 0.0  ;;  %v1145_v52 = vadd.f32 %v1815_v50, %v1028_v0 }
 0x338   : > { %v1136_v51 = vpop.f32.mrf.mxu1 }
 0x339   : > { %1667 = vst [vmem:[#allocation4 + $0x8] sm:$0xff] %v2949_v15   ;;  %v1576_v25 = vpack.c.bf16 %v1184_v14, %v1183_v3  ;;  %v1137_v55 = vadd.f32 %v1136_v51, %v1026_v2  ;;  %v1189_v13 = vmax.f32 %v1145_v52, 0.0 }
 0x33a   : > { %v1816_v54 = vpop.f32.mrf.mxu1 }
 0x33b   : > { %1577 = vst [vmem:[#allocation4] sm:$0xff] %v1576_v25   ;;  %v1148_v34 = vadd.f32 %v1816_v54, %v1029_v53  ;;  %v1187_v37 = vmax.f32 %v1137_v55, 0.0 }
 0x33c   : > { %v1139_v33 = vpop.f32.mrf.mxu1 }
 0x33d   : > { %v1190_v49 = vmax.f32 %v1148_v34, 0.0  ;;  %v1140_v56 = vadd.f32 %v1139_v33, %v1027_v58 }
 0x33e   : > { %v1819_v59 = vpop.f32.mrf.mxu1 }
 0x33f   : > { %v1591_v60 = vpack.c.bf16 %v1190_v49, %v1189_v13  ;;  %v1188_v63 = vmax.f32 %v1140_v56, 0.0  ;;  %v1161_v18 = vadd.f32 %v1819_v59, %v1032_v10 }
 0x340   : > { %v1152_v17 = vpop.f32.mrf.mxu1 }
 0x341   : > { %1669 = vst [vmem:[#allocation4 + $0x18] sm:$0xff] %v1591_v60   ;;  %v1586_v42 = vpack.c.bf16 %v1188_v63, %v1187_v37  ;;  %v1153_v21 = vadd.f32 %v1152_v17, %v1030_v19  ;;  %v1193_v26 = vmax.f32 %v1161_v18, 0.0 }
 0x342   : > { %v1820_v20 = vpop.f32.mrf.mxu1 }
 0x343   : > { %1668 = vst [vmem:[#allocation4 + $0x10] sm:$0xff] %v1586_v42   ;;  %v1164_v22 = vadd.f32 %v1820_v20, %v1033_v46  ;;  %v1191_v1 = vmax.f32 %v1153_v21, 0.0 }
 0x344   : > { %v1155_v24 = vpop.f32.mrf.mxu1 }
 0x345   : > { %v1194_v16 = vmax.f32 %v1164_v22, 0.0  ;;  %v1156_v27 = vadd.f32 %v1155_v24, %v1031_v23 }
 0x346   : > { %v1823_v28 = vpop.f32.mrf.mxu1 }
 0x347   : > { %v1601_v29 = vpack.c.bf16 %v1194_v16, %v1193_v26  ;;  %v1192_v30 = vmax.f32 %v1156_v27, 0.0  ;;  %v1177_v36 = vadd.f32 %v1823_v28, %v1036_v61 }
 0x348   : > { %v1168_v35 = vpop.f32.mrf.mxu1 }
 0x349   : > { %1671 = vst [vmem:[#allocation4 + $0x28] sm:$0xff] %v1601_v29   ;;  %v1596_v57 = vpack.c.bf16 %v1192_v30, %v1191_v1  ;;  %v1169_v39 = vadd.f32 %v1168_v35, %v1034_v6  ;;  %v1197_v8 = vmax.f32 %v1177_v36, 0.0 }
 0x34a   : > { %v1824_v7 = vpop.f32.mrf.mxu1 }
 0x34b   : > { %1670 = vst [vmem:[#allocation4 + $0x20] sm:$0xff] %v1596_v57   ;;  %v1180_v40 = vadd.f32 %v1824_v7, %v1037_v62  ;;  %v1195_v11 = vmax.f32 %v1169_v39, 0.0 }
 0x34c   : > { %v1171_v9 = vpop.f32.mrf.mxu1 }
 0x34d   : > { %v1198_v32 = vmax.f32 %v1180_v40, 0.0  ;;  %v1172_v43 = vadd.f32 %v1171_v9, %v1035_v41 }
 0x34f   : > { %v1611_v44 = vpack.c.bf16 %v1198_v32, %v1197_v8  ;;  %v1196_v45 = vmax.f32 %v1172_v43, 0.0  ;;  %1282 = sbr.rel (%p1463_p12) target bundleno = 856 (0x358), region = 65 }
 0x351   : > { %1673 = vst [vmem:[#allocation4 + $0x38] sm:$0xff] %v1611_v44   ;;  %v1606_v47 = vpack.c.bf16 %v1196_v45, %v1195_v11 }
 0x353   : > { %1672 = vst [vmem:[#allocation4 + $0x30] sm:$0xff] %v1606_v47  }
 0x354   : > { %1617 = vst [vmem:[#allocation14] sm:$0xff] %v1576_v25   ;;  %1674 = vst [vmem:[#allocation14 + $0x8] sm:$0xff] %v2949_v15  }
 0x355   : > { %1675 = vst [vmem:[#allocation14 + $0x10] sm:$0xff] %v1586_v42   ;;  %1676 = vst [vmem:[#allocation14 + $0x18] sm:$0xff] %v1591_v60  }
 0x356   : > { %1677 = vst [vmem:[#allocation14 + $0x20] sm:$0xff] %v1596_v57   ;;  %1678 = vst [vmem:[#allocation14 + $0x28] sm:$0xff] %v1601_v29  }
 0x357   : > { %1679 = vst [vmem:[#allocation14 + $0x30] sm:$0xff] %v1606_v47   ;;  %1680 = vst [vmem:[#allocation14 + $0x38] sm:$0xff] %v1611_v44  }
 0x358 PF: > { %p1937_p3 = scmp.eq.s32.totalorder %s2531_s10, 1  ;;  %s2463_s13 = smov [#allocation14]  }
 0x359   : > { %s1305_s29 = sshll.u32 %s2463_s13, 4  ;;  %s1306_s29 = int_to_ptr.vmem [resolvable:$true] %s1305_s29 }
 0x35a   : > { %s2252_s15 = scalar_lea.vmem %s1306_s29, 1024  ;;  %p2259_p1 = scmp.lt.s32.totalorder %s1306_s29, %s1306_s29 }
 0x35b   : > { %p2253_p2 = scmp.ne.s32.totalorder %s1306_s29, %s2252_s15  ;;  %p2260_p5 = scmp.lt.s32.totalorder %s2252_s15, %s2252_s15 }
 0x35d   : > { %p2254_p9 = pnand %p2253_p2, %p1937_p3  ;;  %p2261_p10 = por %p2260_p5, %p2259_p1 }
 0x35f   : > { %p2255_p13 = pneg %p2254_p9 }
 0x361   : > { %p2262_p0 = pnand %p2261_p10, %p2255_p13 }
 0x363   : > { %2265 = shalt.err (!%p2262_p0)
}
 0x364   : > { %s2464_s18 = smov 64   ;;  %s2465_s19 = smov 4  }
 0x365   : > { %1917 = dma.vmem_to_hbm [thread:$0]  (%p1937_p3), %s1306_s29, 1024, %s3010_s7, [#allocation10], %s2464_s18, %s2464_s18, %s2465_s19  }
 0x366   : > { %2373 = dma.done.wait (%p1937_p3), [#allocation10], 1024  }
 0x367   : > { %2375 = vsyncadd (%p1937_p3), [#allocation10], 4294966272 }
 0x368 PF: > { %p24_p4 = scmp.ge.s32.totalorder %s2534_s11, 4   ;;  %s3029_s0 = smov %s2382_s8 }
 0x369   : > { %s3030_s8 = smov %s2386_s1  ;;  %s3031_s1 = smov %s2544_s14 }
 0x36a   : > { %s3032_s9 = smov %s2534_s11  ;;  %26 = sbr.rel (!%p24_p4) target bundleno = 19 (0x13), region = 97 }
 0x36f   :  { %1321 = vsyncpa [#allocation9], 1 }
 0x370   :  { %1323 = vsyncpa [#allocation9 + $0x1], 1 }
 0x371   :  { %1324 = vsyncpa [#allocation12], 1 }
 0x372   :  { %1325 = vsyncpa [#allocation10], 1 }
 0x373   :  { %1327 = vsyncpa [#allocation10 + $0x1], 1 }

</bundles_post_ra>
